<compile_context>
chip_gen: v7x
topology: tpu7x:2x2x1
jax: 0.10.0
libtpu: 0.0.40
codegen_flags: <defaults>
</compile_context>

<pallas_src>
import jax
import jax.numpy as jnp
from jax.experimental import pallas as pl
from jax.experimental.pallas import tpu as pltpu


def _pgnn_kernel(x_ref, w1_ref, b1_ref, w2_ref, b2_ref, w3_ref, b3_ref,
                 w4_ref, b4_ref, ascale_ref, abias_ref, o_ref):
    """Fused MLP (BN folded into Linears) + per-column custom activation."""
    x = x_ref[...].astype(jnp.float32)
    h = jnp.tanh(
        jnp.dot(x, w1_ref[...], preferred_element_type=jnp.float32) + b1_ref[...]
    )
    h = jnp.tanh(
        jnp.dot(h, w2_ref[...], preferred_element_type=jnp.float32) + b2_ref[...]
    )
    h = jnp.tanh(
        jnp.dot(h, w3_ref[...], preferred_element_type=jnp.float32) + b3_ref[...]
    )
    raw = jnp.dot(h, w4_ref[...], preferred_element_type=jnp.float32) + b4_ref[...]
    # CustomActivation, folded: E_min + (E_max-E_min)*(tanh+1)/2 == s*tanh + (E_min+s)
    o_ref[...] = (ascale_ref[...] * jnp.tanh(raw) + abias_ref[...]).astype(o_ref.dtype)


def _fold_bn_into_linear(w, b, gamma, beta, mean, var, eps=1e-5):
    """Inference-mode BatchNorm1d folded into the preceding Linear layer."""
    scale = gamma / jnp.sqrt(var + eps)          # (H,)
    w_f = w * scale[None, :]                     # (in, H)
    b_f = (b - mean) * scale + beta              # (H,)
    return w_f.astype(jnp.float32), b_f.astype(jnp.float32)


def pgnn_forward(x, params, e_min_max, *, block_rows: int = 2048):
    """PGNN forward pass.

    x:       (B, 2) float array
    params:  dict with w1,b1,g1,beta1,m1,v1, w2,..., w3,..., w4,b4
    e_min_max: list of 3 (E_min, E_max) pairs for the output columns.
    """
    w1f, b1f = _fold_bn_into_linear(params["w1"], params["b1"], params["g1"],
                                    params["beta1"], params["m1"], params["v1"])
    w2f, b2f = _fold_bn_into_linear(params["w2"], params["b2"], params["g2"],
                                    params["beta2"], params["m2"], params["v2"])
    w3f, b3f = _fold_bn_into_linear(params["w3"], params["b3"], params["g3"],
                                    params["beta3"], params["m3"], params["v3"])
    w4 = params["w4"].astype(jnp.float32)
    b4 = params["b4"].astype(jnp.float32)

    e = jnp.asarray(e_min_max, dtype=jnp.float32)          # (3, 2)
    e_min, e_max = e[:, 0], e[:, 1]
    act_scale = 0.5 * (e_max - e_min)                       # (3,)
    act_bias = e_min + act_scale                            # (3,)

    B, F = x.shape
    H = w1f.shape[1]
    O = w4.shape[1]

    # Row-block selection: biggest block that makes sense, multiple of 8 when
    # blocking is needed; no divisibility fallback (Pallas masks the ragged tail).
    if B <= block_rows:
        blk = B                                  # full batch, single grid step
    else:
        blk = max(8, (block_rows // 8) * 8)
    grid = (pl.cdiv(B, blk),)

    const_spec_h = pl.BlockSpec((1, H), lambda i: (0, 0))
    const_spec_o = pl.BlockSpec((1, O), lambda i: (0, 0))

    out = pl.pallas_call(
        _pgnn_kernel,
        out_shape=jax.ShapeDtypeStruct((B, O), x.dtype),
        grid_spec=pltpu.PrefetchScalarGridSpec(
            num_scalar_prefetch=0,
            grid=grid,
            in_specs=[
                pl.BlockSpec((blk, F), lambda i: (i, 0)),       # x rows
                pl.BlockSpec((F, H), lambda i: (0, 0)),         # w1 (BN-folded)
                const_spec_h,                                   # b1
                pl.BlockSpec((H, H), lambda i: (0, 0)),         # w2
                const_spec_h,                                   # b2
                pl.BlockSpec((H, H), lambda i: (0, 0)),         # w3
                const_spec_h,                                   # b3
                pl.BlockSpec((H, O), lambda i: (0, 0)),         # w4
                const_spec_o,                                   # b4
                const_spec_o,                                   # act_scale
                const_spec_o,                                   # act_bias
            ],
            out_specs=pl.BlockSpec((blk, O), lambda i: (i, 0)),
        ),
        compiler_params=pltpu.CompilerParams(
            dimension_semantics=("parallel",),
        ),
    )(
        x,
        w1f, b1f.reshape(1, H),
        w2f, b2f.reshape(1, H),
        w3f, b3f.reshape(1, H),
        w4, b4.reshape(1, O),
        act_scale.reshape(1, O), act_bias.reshape(1, O),
    )
    return out


def _reference_forward(x, p, e_min_max, eps=1e-5):
    """Pure-JAX reference matching the PyTorch module (eval-mode BatchNorm)."""
    def bn(y, g, b, m, v):
        return (y - m) * (g / jnp.sqrt(v + eps)) + b

    h = jnp.tanh(bn(x @ p["w1"] + p["b1"], p["g1"], p["beta1"], p["m1"], p["v1"]))
    h = jnp.tanh(bn(h @ p["w2"] + p["b2"], p["g2"], p["beta2"], p["m2"], p["v2"]))
    h = jnp.tanh(bn(h @ p["w3"] + p["b3"], p["g3"], p["beta3"], p["m3"], p["v3"]))
    raw = h @ p["w4"] + p["b4"]
    cols = []
    for j in range(raw.shape[1]):
        lo, hi = e_min_max[j]
        cols.append(lo + (hi - lo) * (jnp.tanh(raw[:, j]) + 1.0) / 2.0)
    return jnp.stack(cols, axis=1)


if __name__ == "__main__":
    key = jax.random.PRNGKey(0)
    ks = jax.random.split(key, 20)

    B, IN, H, OUT = 64, 2, 72, 3
    x = jax.random.normal(ks[0], (B, IN), dtype=jnp.float32)

    def lin(kw, kb, fan_in, fan_out):
        w = 0.2 * jax.random.normal(kw, (fan_in, fan_out), dtype=jnp.float32)
        b = 0.1 * jax.random.normal(kb, (fan_out,), dtype=jnp.float32)
        return w, b

    def bn_params(kg, kb, km, kv, n):
        g = jax.random.uniform(kg, (n,), minval=0.5, maxval=1.5, dtype=jnp.float32)
        beta = 0.1 * jax.random.normal(kb, (n,), dtype=jnp.float32)
        m = 0.1 * jax.random.normal(km, (n,), dtype=jnp.float32)
        v = jax.random.uniform(kv, (n,), minval=0.5, maxval=1.5, dtype=jnp.float32)
        return g, beta, m, v

    w1, b1 = lin(ks[1], ks[2], IN, H)
    g1, beta1, m1, v1 = bn_params(ks[3], ks[4], ks[5], ks[6], H)
    w2, b2 = lin(ks[7], ks[8], H, H)
    g2, beta2, m2, v2 = bn_params(ks[9], ks[10], ks[11], ks[12], H)
    w3, b3 = lin(ks[13], ks[14], H, H)
    g3, beta3, m3, v3 = bn_params(ks[15], ks[16], ks[17], ks[18], H)
    w4, b4 = lin(ks[19], ks[0], H, OUT)

    params = dict(
        w1=w1, b1=b1, g1=g1, beta1=beta1, m1=m1, v1=v1,
        w2=w2, b2=b2, g2=g2, beta2=beta2, m2=m2, v2=v2,
        w3=w3, b3=b3, g3=g3, beta3=beta3, m3=m3, v3=v3,
        w4=w4, b4=b4,
    )

    E_min_max = [(-5.0, 3.0), (0.0, 10.0), (1.0, 2.0)]

    out = pgnn_forward(x, params, E_min_max)
    out = jax.block_until_ready(out)

    ref = _reference_forward(x, params, E_min_max)

    assert out.shape == (B, OUT) and out.dtype == x.dtype
    assert jnp.allclose(out, ref, atol=1e-4, rtol=1e-4), (
        float(jnp.max(jnp.abs(out - ref)))
    )

    print("KERNEL_OK")
</pallas_src>

<mosaic_0001>
module attributes {stable_mosaic.version = 11 : i64} {
  func.func @_pgnn_kernel(%arg0: i32, %arg1: memref<64x2xf32, #tpu.memory_space<vmem>>, %arg2: memref<2x72xf32, #tpu.memory_space<vmem>>, %arg3: memref<1x72xf32, #tpu.memory_space<vmem>>, %arg4: memref<72x72xf32, #tpu.memory_space<vmem>>, %arg5: memref<1x72xf32, #tpu.memory_space<vmem>>, %arg6: memref<72x72xf32, #tpu.memory_space<vmem>>, %arg7: memref<1x72xf32, #tpu.memory_space<vmem>>, %arg8: memref<72x3xf32, #tpu.memory_space<vmem>>, %arg9: memref<1x3xf32, #tpu.memory_space<vmem>>, %arg10: memref<1x3xf32, #tpu.memory_space<vmem>>, %arg11: memref<1x3xf32, #tpu.memory_space<vmem>>, %arg12: memref<64x3xf32, #tpu.memory_space<vmem>>) attributes {dimension_semantics = [#tpu.dimension_semantics<parallel>], iteration_bounds = array<i64: 1>, scalar_prefetch = 0 : i64, scratch_operands = 0 : i64, tpu.core_type = #tpu.core_type<tc>, window_params = [{transform_indices = @transform_0, window_bounds = array<i64: 64, 2>}, {pipeline_mode = #tpu.pipeline_mode<synchronous>, transform_indices = @transform_1, window_bounds = array<i64: 2, 72>}, {pipeline_mode = #tpu.pipeline_mode<synchronous>, transform_indices = @transform_2, window_bounds = array<i64: 1, 72>}, {pipeline_mode = #tpu.pipeline_mode<synchronous>, transform_indices = @transform_3, window_bounds = array<i64: 72, 72>}, {pipeline_mode = #tpu.pipeline_mode<synchronous>, transform_indices = @transform_4, window_bounds = array<i64: 1, 72>}, {pipeline_mode = #tpu.pipeline_mode<synchronous>, transform_indices = @transform_5, window_bounds = array<i64: 72, 72>}, {pipeline_mode = #tpu.pipeline_mode<synchronous>, transform_indices = @transform_6, window_bounds = array<i64: 1, 72>}, {pipeline_mode = #tpu.pipeline_mode<synchronous>, transform_indices = @transform_7, window_bounds = array<i64: 72, 3>}, {pipeline_mode = #tpu.pipeline_mode<synchronous>, transform_indices = @transform_8, window_bounds = array<i64: 1, 3>}, {pipeline_mode = #tpu.pipeline_mode<synchronous>, transform_indices = @transform_9, window_bounds = array<i64: 1, 3>}, {pipeline_mode = #tpu.pipeline_mode<synchronous>, transform_indices = @transform_10, window_bounds = array<i64: 1, 3>}, {transform_indices = @transform_11, window_bounds = array<i64: 64, 3>}]} {
    %c0 = arith.constant 0 : index
    %c0_0 = arith.constant 0 : index
    %0 = vector.load %arg1[%c0, %c0_0] : memref<64x2xf32, #tpu.memory_space<vmem>>, vector<64x2xf32>
    %c0_1 = arith.constant 0 : index
    %c0_2 = arith.constant 0 : index
    %1 = vector.load %arg2[%c0_1, %c0_2] : memref<2x72xf32, #tpu.memory_space<vmem>>, vector<2x72xf32>
    %cst = arith.constant dense<0.000000e+00> : vector<64x72xf32>
    %2 = tpu.matmul %0, %1, %cst {dimension_numbers = #tpu.dot_dimension_numbers<[1], [0], [0], [1], [0, 0, 1, 1], [], []>} : vector<64x2xf32>, vector<2x72xf32>, vector<64x72xf32> -> vector<64x72xf32>
    %c0_3 = arith.constant 0 : index
    %c0_4 = arith.constant 0 : index
    %3 = vector.load %arg3[%c0_3, %c0_4] : memref<1x72xf32, #tpu.memory_space<vmem>>, vector<1x72xf32>
    %4 = vector.broadcast %3 : vector<1x72xf32> to vector<64x72xf32>
    %5 = arith.addf %2, %4 : vector<64x72xf32>
    %6 = math.tanh %5 : vector<64x72xf32>
    %c0_5 = arith.constant 0 : index
    %c0_6 = arith.constant 0 : index
    %7 = vector.load %arg4[%c0_5, %c0_6] : memref<72x72xf32, #tpu.memory_space<vmem>>, vector<72x72xf32>
    %cst_7 = arith.constant dense<0.000000e+00> : vector<64x72xf32>
    %8 = tpu.matmul %6, %7, %cst_7 {dimension_numbers = #tpu.dot_dimension_numbers<[1], [0], [0], [1], [0, 0, 1, 1], [], []>} : vector<64x72xf32>, vector<72x72xf32>, vector<64x72xf32> -> vector<64x72xf32>
    %c0_8 = arith.constant 0 : index
    %c0_9 = arith.constant 0 : index
    %9 = vector.load %arg5[%c0_8, %c0_9] : memref<1x72xf32, #tpu.memory_space<vmem>>, vector<1x72xf32>
    %10 = vector.broadcast %9 : vector<1x72xf32> to vector<64x72xf32>
    %11 = arith.addf %8, %10 : vector<64x72xf32>
    %12 = math.tanh %11 : vector<64x72xf32>
    %c0_10 = arith.constant 0 : index
    %c0_11 = arith.constant 0 : index
    %13 = vector.load %arg6[%c0_10, %c0_11] : memref<72x72xf32, #tpu.memory_space<vmem>>, vector<72x72xf32>
    %cst_12 = arith.constant dense<0.000000e+00> : vector<64x72xf32>
    %14 = tpu.matmul %12, %13, %cst_12 {dimension_numbers = #tpu.dot_dimension_numbers<[1], [0], [0], [1], [0, 0, 1, 1], [], []>} : vector<64x72xf32>, vector<72x72xf32>, vector<64x72xf32> -> vector<64x72xf32>
    %c0_13 = arith.constant 0 : index
    %c0_14 = arith.constant 0 : index
    %15 = vector.load %arg7[%c0_13, %c0_14] : memref<1x72xf32, #tpu.memory_space<vmem>>, vector<1x72xf32>
    %16 = vector.broadcast %15 : vector<1x72xf32> to vector<64x72xf32>
    %17 = arith.addf %14, %16 : vector<64x72xf32>
    %18 = math.tanh %17 : vector<64x72xf32>
    %c0_15 = arith.constant 0 : index
    %c0_16 = arith.constant 0 : index
    %19 = vector.load %arg8[%c0_15, %c0_16] : memref<72x3xf32, #tpu.memory_space<vmem>>, vector<72x3xf32>
    %cst_17 = arith.constant dense<0.000000e+00> : vector<64x3xf32>
    %20 = tpu.matmul %18, %19, %cst_17 {dimension_numbers = #tpu.dot_dimension_numbers<[1], [0], [0], [1], [0, 0, 1, 1], [], []>} : vector<64x72xf32>, vector<72x3xf32>, vector<64x3xf32> -> vector<64x3xf32>
    %c0_18 = arith.constant 0 : index
    %c0_19 = arith.constant 0 : index
    %21 = vector.load %arg9[%c0_18, %c0_19] : memref<1x3xf32, #tpu.memory_space<vmem>>, vector<1x3xf32>
    %22 = vector.broadcast %21 : vector<1x3xf32> to vector<64x3xf32>
    %23 = arith.addf %20, %22 : vector<64x3xf32>
    %c0_20 = arith.constant 0 : index
    %c0_21 = arith.constant 0 : index
    %24 = vector.load %arg10[%c0_20, %c0_21] : memref<1x3xf32, #tpu.memory_space<vmem>>, vector<1x3xf32>
    %25 = math.tanh %23 : vector<64x3xf32>
    %26 = vector.broadcast %24 : vector<1x3xf32> to vector<64x3xf32>
    %27 = arith.mulf %26, %25 : vector<64x3xf32>
    %c0_22 = arith.constant 0 : index
    %c0_23 = arith.constant 0 : index
    %28 = vector.load %arg11[%c0_22, %c0_23] : memref<1x3xf32, #tpu.memory_space<vmem>>, vector<1x3xf32>
    %29 = vector.broadcast %28 : vector<1x3xf32> to vector<64x3xf32>
    %30 = arith.addf %27, %29 : vector<64x3xf32>
    %c0_24 = arith.constant 0 : index
    %c0_25 = arith.constant 0 : index
    %31 = vector.load %arg12[%c0_24, %c0_25] : memref<64x3xf32, #tpu.memory_space<vmem>>, vector<64x3xf32>
    tpu.vector_store %arg12[%c0_24, %c0_25], %30 {strides = array<i32>} : memref<64x3xf32, #tpu.memory_space<vmem>>, vector<64x3xf32>,
    return
  }
  func.func @transform_0(%arg0: i32) -> (i32, i32) {
    %c0_i32 = arith.constant 0 : i32
    %c0_i32_0 = arith.constant 0 : i32
    return %arg0, %c0_i32 : i32, i32
  }
  func.func @transform_1(%arg0: i32) -> (i32, i32) {
    %c0_i32 = arith.constant 0 : i32
    %c0_i32_0 = arith.constant 0 : i32
    %c0_i32_1 = arith.constant 0 : i32
    return %c0_i32, %c0_i32_0 : i32, i32
  }
  func.func @transform_2(%arg0: i32) -> (i32, i32) {
    %c0_i32 = arith.constant 0 : i32
    %c0_i32_0 = arith.constant 0 : i32
    %c0_i32_1 = arith.constant 0 : i32
    return %c0_i32, %c0_i32_0 : i32, i32
  }
  func.func @transform_3(%arg0: i32) -> (i32, i32) {
    %c0_i32 = arith.constant 0 : i32
    %c0_i32_0 = arith.constant 0 : i32
    %c0_i32_1 = arith.constant 0 : i32
    return %c0_i32, %c0_i32_0 : i32, i32
  }
  func.func @transform_4(%arg0: i32) -> (i32, i32) {
    %c0_i32 = arith.constant 0 : i32
    %c0_i32_0 = arith.constant 0 : i32
    %c0_i32_1 = arith.constant 0 : i32
    return %c0_i32, %c0_i32_0 : i32, i32
  }
  func.func @transform_5(%arg0: i32) -> (i32, i32) {
    %c0_i32 = arith.constant 0 : i32
    %c0_i32_0 = arith.constant 0 : i32
    %c0_i32_1 = arith.constant 0 : i32
    return %c0_i32, %c0_i32_0 : i32, i32
  }
  func.func @transform_6(%arg0: i32) -> (i32, i32) {
    %c0_i32 = arith.constant 0 : i32
    %c0_i32_0 = arith.constant 0 : i32
    %c0_i32_1 = arith.constant 0 : i32
    return %c0_i32, %c0_i32_0 : i32, i32
  }
  func.func @transform_7(%arg0: i32) -> (i32, i32) {
    %c0_i32 = arith.constant 0 : i32
    %c0_i32_0 = arith.constant 0 : i32
    %c0_i32_1 = arith.constant 0 : i32
    return %c0_i32, %c0_i32_0 : i32, i32
  }
  func.func @transform_8(%arg0: i32) -> (i32, i32) {
    %c0_i32 = arith.constant 0 : i32
    %c0_i32_0 = arith.constant 0 : i32
    %c0_i32_1 = arith.constant 0 : i32
    return %c0_i32, %c0_i32_0 : i32, i32
  }
  func.func @transform_9(%arg0: i32) -> (i32, i32) {
    %c0_i32 = arith.constant 0 : i32
    %c0_i32_0 = arith.constant 0 : i32
    %c0_i32_1 = arith.constant 0 : i32
    return %c0_i32, %c0_i32_0 : i32, i32
  }
  func.func @transform_10(%arg0: i32) -> (i32, i32) {
    %c0_i32 = arith.constant 0 : i32
    %c0_i32_0 = arith.constant 0 : i32
    %c0_i32_1 = arith.constant 0 : i32
    return %c0_i32, %c0_i32_0 : i32, i32
  }
  func.func @transform_11(%arg0: i32) -> (i32, i32) {
    %c0_i32 = arith.constant 0 : i32
    %c0_i32_0 = arith.constant 0 : i32
    return %arg0, %c0_i32 : i32, i32
  }
}

</mosaic_0001>

<bundles_post_ra>
// kernel: tpu_custom_call.1
= control target key start
LH: loop header
LB: loop body
LE: loop exit
PB: predicated region body
PF: predicated region fallthrough
CT: control target
= control target key end

     0   :  { %16 = vsyncpa [#allocation3], 0  ;;  %s1062_s17 = smov [#allocation2]   ;;  %s1322_s0 = inlined_call_operand.vmem [shape: f32[64,2], index: 0, kind: input, shape index: {}]   ;;  %s1323_s1 = inlined_call_operand.hbm [shape: f32[2,72], index: 1, kind: input, shape index: {}]   ;;  %s1324_s2 = inlined_call_operand.vmem [shape: f32[1,72], index: 2, kind: input, shape index: {}]   ;;  %s1325_s3 = inlined_call_operand.vmem [shape: f32[72,72], index: 3, kind: input, shape index: {}]   ;;  %s1326_s4 = inlined_call_operand.vmem [shape: f32[1,72], index: 4, kind: input, shape index: {}]   ;;  %s1327_s5 = inlined_call_operand.vmem [shape: f32[72,72], index: 5, kind: input, shape index: {}]   ;;  %s1328_s6 = inlined_call_operand.vmem [shape: f32[1,72], index: 6, kind: input, shape index: {}]   ;;  %s1329_s7 = inlined_call_operand.vmem [shape: f32[72,3], index: 7, kind: input, shape index: {}]   ;;  %s1330_s8 = inlined_call_operand.vmem [shape: f32[1,3], index: 8, kind: input, shape index: {}]   ;;  %s1331_s9 = inlined_call_operand.vmem [shape: f32[1,3], index: 9, kind: input, shape index: {}]   ;;  %s1332_s10 = inlined_call_operand.vmem [shape: f32[1,3], index: 10, kind: input, shape index: {}]   ;;  %s1333_s11 = inlined_call_operand.vmem [shape: f32[64,3], index: 11, kind: output, shape index: {}]  }
   0x1   :  { %s25_s18 = sshll.u32 %s1062_s17, 4  ;;  %s1038_s21 = scalar_lea.hbm %s1323_s1, 32  ;;  %s26_s18 = int_to_ptr.vmem [resolvable:$true] %s25_s18 }
   0x2   :  { %p1039_p0 = scmp.ne.s32.totalorder %s1323_s1, %s1038_s21  ;;  %p1042_p1 = scmp.lt.u32.totalorder %s1038_s21, %s1323_s1 }
   0x4   :  { %p1044_p2 = pnand %p1042_p1, %p1039_p0 }
   0x6   :  { %1047 = shalt.err (!%p1044_p2)
}
   0x7   :  { %s1048_s26 = scalar_lea.vmem %s26_s18, 32  ;;  %p1053_p4 = scmp.lt.s32.totalorder %s26_s18, %s26_s18 }
   0x8   :  { %p1049_p3 = scmp.ne.s32.totalorder %s26_s18, %s1048_s26  ;;  %p1054_p5 = scmp.lt.s32.totalorder %s1048_s26, %s1048_s26 }
   0xa   :  { %p1055_p6 = por %p1054_p5, %p1053_p4 }
   0xc   :  { %p1056_p7 = pnand %p1055_p6, %p1049_p3 }
   0xe   :  { %1059 = shalt.err (!%p1056_p7)
}
   0xf   :  { %28 = dma.hbm_to_vmem [thread:$0]  %s1323_s1, 32, %s26_s18, [#allocation3]  }
  0x10   :  { %1060 = dma.done.wait [#allocation3], 32  }
  0x11   :  { %1061 = vsyncadd [#allocation3], 4294967264  ;;  %vm91_vm0 = vcmask 1041408   ;;  %vm66_vm1 = vcmask 15360   ;;  %v58_v0 = vld [vmem:[#allocation2] sm:$0x3] }
  0x12   :  { %v50_v1 = vld [vmem:[%s1322_s0] sm:$0xff]  ;;  %v51_v2 = vld [vmem:[%s1322_s0 + $0x8] sm:$0xff]  ;;  %811 = vmatprep.subr.msk.mxu0 %vm91_vm0, %v58_v0  ;;  %v52_v3 = vld [vmem:[%s1322_s0 + $0x10] sm:$0xff]  ;;  %vm224_vm2 = vcmask 588800   ;;  %vm698_vm3 = vcmask 23552  }
  0x13   :  { %813 = vmatprep.mubr.msk.f32.mxu0 %vm66_vm1, %v50_v1  ;;  %812 = vmatpush3.msk.msra.mxu0 %vm91_vm0, %v58_v0  ;;  %v208_v4 = vld [vmem:[%s1325_s3] sm:$0xff]  ;;  %v209_v5 = vld [vmem:[%s1325_s3 + $0x8] sm:$0xff]  ;;  %v53_v6 = vld [vmem:[%s1322_s0 + $0x18] sm:$0xff] }
  0x14   :  { %814 = vmatmul.mubr.msk.f32.vlgmr.msra.gmra.mrb[0].mxu0 %vm66_vm1, %v51_v2  ;;  %v915_v7 = vpack.c.bf16 %v209_v5, %v208_v4  ;;  %v54_v8 = vld [vmem:[%s1322_s0 + $0x20] sm:$0xff]  ;;  %v55_v9 = vld [vmem:[%s1322_s0 + $0x28] sm:$0xff]  ;;  %v56_v10 = vld [vmem:[%s1322_s0 + $0x30] sm:$0xff] }
  0x15   :  { %816 = vmatprep.mubr.msk.f32.mxu0 %vm66_vm1, %v52_v3  ;;  %v57_v11 = vld [vmem:[%s1322_s0 + $0x38] sm:$0xff]  ;;  %v210_v12 = vld [vmem:[%s1325_s3 + $0x10] sm:$0xff]  ;;  %v212_v15 = vld [vmem:[%s1325_s3 + $0x20] sm:$0xff] }
  0x16   :  { %916 = vmatprep.subr.bf16.mxu1 %v915_v7  ;;  %v211_v13 = vld [vmem:[%s1325_s3 + $0x18] sm:$0xff]  ;;  %v213_v16 = vld [vmem:[%s1325_s3 + $0x28] sm:$0xff]  ;;  %v214_v18 = vld [vmem:[%s1325_s3 + $0x30] sm:$0xff] }
  0x17   :  { %918 = vmatpush3.bf16.msra.mxu1 %v915_v7  ;;  %v919_v14 = vpack.c.bf16 %v211_v13, %v210_v12  ;;  %v923_v17 = vpack.c.bf16 %v213_v16, %v212_v15  ;;  %v215_v19 = vld [vmem:[%s1325_s3 + $0x38] sm:$0xff]  ;;  %v216_v21 = vld [vmem:[%s1325_s3 + $0x40] sm:$0xff]  ;;  %v363_v23 = vld [vmem:[%s1327_s5 + $0x8] sm:$0xff] }
  0x18   :  { %817 = vmatmul.mubr.msk.f32.gmra.mrb[2].mxu0 %vm66_vm1, %v53_v6  ;;  %v927_v20 = vpack.c.bf16 %v215_v19, %v214_v18  ;;  %v362_v22 = vld [vmem:[%s1327_s5] sm:$0xff]  ;;  %v364_v50 = vld [vmem:[%s1327_s5 + $0x10] sm:$0xff]  ;;  %v365_v51 = vld [vmem:[%s1327_s5 + $0x18] sm:$0xff] }
  0x19   :  { %819 = vmatprep.mubr.msk.f32.mxu0 %vm66_vm1, %v54_v8  ;;  %920 = vmatprep.subr.bf16.mxu1 %v919_v14  ;;  %v931_v24 = vpack.c.bf16 %v363_v23, %v362_v22  ;;  %v712_v25 = vld [vmem:[%s1324_s2] ss:$0 sm:$0xff]  ;;  %v935_v52 = vpack.c.bf16 %v365_v51, %v364_v50  ;;  %v367_v54 = vld [vmem:[%s1327_s5 + $0x28] sm:$0xff]  ;;  %v368_v56 = vld [vmem:[%s1327_s5 + $0x30] sm:$0xff] }
  0x1a   :  { %v366_v53 = vld [vmem:[%s1327_s5 + $0x20] sm:$0xff]  ;;  %v369_v57 = vld [vmem:[%s1327_s5 + $0x38] sm:$0xff]  ;;  %v516_v61 = vld [vmem:[%s1329_s7 + $0x8] sm:$0xff] }
  0x1b   :  { %922 = vmatpush3.bf16.msra.mxu1 %v919_v14  ;;  %932 = vmatprep.subr.bf16.mxu0 %v931_v24  ;;  %v939_v55 = vpack.c.bf16 %v367_v54, %v366_v53  ;;  %v943_v58 = vpack.c.bf16 %v369_v57, %v368_v56  ;;  %v370_v59 = vld [vmem:[%s1327_s5 + $0x40] sm:$0xff] }
  0x1c   :  { %820 = vmatmul.mubr.msk.f32.gmra.mrb[4].mxu0 %vm66_vm1, %v55_v9  ;;  %924 = vmatprep.subr.bf16.mxu1 %v923_v17  ;;  %v515_v60 = vld [vmem:[%s1329_s7] sm:$0xff] }
  0x1d   :  { %822 = vmatprep.mubr.msk.f32.mxu0 %vm66_vm1, %v56_v10  ;;  %934 = vmatpush3.bf16.msra.mxu0 %v931_v24  ;;  %v947_v62 = vpack.c.bf16 %v516_v61, %v515_v60  ;;  %v722_v63 = vld [vmem:[%s1326_s4] ss:$0 sm:$0xff]  ;;  %v517_v24 = vld [vmem:[%s1329_s7 + $0x10] sm:$0xff] }
  0x1e   :  { %936 = vmatprep.subr.bf16.mxu0 %v935_v52 }
  0x1f   :  { %926 = vmatpush3.bf16.msra.mxu1 %v923_v17 }
  0x20   :  { %823 = vmatmul.mubr.msk.f32.gmra.mrb[6].mxu0 %vm66_vm1, %v57_v11  ;;  %928 = vmatprep.subr.bf16.mxu1 %v927_v20 }
  0x21   :  { %938 = vmatpush3.bf16.msra.mxu0 %v935_v52 }
  0x22   :  { %940 = vmatprep.subr.bf16.mxu0 %v939_v55 }
  0x23   :  { %930 = vmatpush3.bf16.msra.mxu1 %v927_v20 }
  0x24   :  { %841 = vmatprep.subr.mxu1 %v216_v21 }
  0x25   :  { %942 = vmatpush3.bf16.msra.mxu0 %v939_v55 }
  0x26   :  { %944 = vmatprep.subr.bf16.mxu0 %v943_v58 }
  0x27   :  { %842 = vmatpush3.msra.mxu1 %v216_v21 }
  0x28   :  { %963 = vmatprep.subr.bf16.mxu1 %v947_v62 }
  0x29   :  { %946 = vmatpush3.bf16.msra.mxu0 %v943_v58 }
  0x2a   :  { %871 = vmatprep.subr.mxu0 %v370_v59 }
  0x2d   :  { %872 = vmatpush3.msra.mxu0 %v370_v59  ;;  %v740_v59 = vld [vmem:[%s1330_s8] ss:$0 sm:$0xff] }
  0x2e   :  { %948 = vmatprep.subr.bf16.mxu0 %v947_v62 }
  0xe7   :  { %v815_v26 = vpop.f32.mrb[0].mxu0 }
  0xe8   :  { %v167_v27 = vadd.f32 %v815_v26, %v712_v25  ;;  %v161_v28 = vpop.f32.mrb[1].mxu0 }
  0xe9   :  { %v162_v29 = vadd.f32 %v712_v25, %v161_v28  ;;  %v520_v28 = vld [vmem:[%s1329_s7 + $0x28] sm:$0xff] }
  0xeb   :  { %974 = vtanh.f32 %v162_v29  ;;  %v818_v30 = vpop.f32.mrb[2].mxu0 }
  0xec   :  { %976 = vtanh.f32 %v167_v27  ;;  %v177_v31 = vadd.f32 %v818_v30, %v712_v25  ;;  %v171_v32 = vpop.f32.mrb[3].mxu0  ;;  %v519_v27 = vld [vmem:[%s1329_s7 + $0x20] sm:$0xff]  ;;  %v521_v30 = vld [vmem:[%s1329_s7 + $0x30] sm:$0xff] }
  0xed   :  { %v172_v33 = vadd.f32 %v712_v25, %v171_v32  ;;  %v955_v29 = vpack.c.bf16 %v520_v28, %v519_v27 }
  0xef   :  { %978 = vtanh.f32 %v172_v33  ;;  %v821_v34 = vpop.f32.mrb[4].mxu0  ;;  %v523_v33 = vld [vmem:[%s1329_s7 + $0x40] sm:$0xff] }
  0xf0   :  { %980 = vtanh.f32 %v177_v31  ;;  %v187_v35 = vadd.f32 %v821_v34, %v712_v25  ;;  %v181_v36 = vpop.f32.mrb[5].mxu0  ;;  %v522_v31 = vld [vmem:[%s1329_s7 + $0x38] sm:$0xff]  ;;  %v731_v34 = vld [vmem:[%s1328_s6] ss:$0 sm:$0xff] }
  0xf1   :  { %v182_v37 = vadd.f32 %v712_v25, %v181_v36  ;;  %v959_v32 = vpack.c.bf16 %v522_v31, %v521_v30 }
  0xf3   :  { %982 = vtanh.f32 %v182_v37  ;;  %v824_v38 = vpop.f32.mrb[6].mxu0 }
  0xf4   :  { %984 = vtanh.f32 %v187_v35  ;;  %v197_v39 = vadd.f32 %v824_v38, %v712_v25  ;;  %v191_v40 = vpop.f32.mrb[7].mxu0 }
  0xf5   :  { %v975_v41 = vpop.eup %974  ;;  %v192_v42 = vadd.f32 %v712_v25, %v191_v40  ;;  %v518_v25 = vld [vmem:[%s1329_s7 + $0x18] sm:$0xff] }
  0xf6   :  { %v977_v43 = vpop.eup %976  ;;  %843 = vmatprep.mubr.msk.f32.mxu1 %vm224_vm2, %v975_v41  ;;  %v951_v26 = vpack.c.bf16 %v518_v25, %v517_v24 }
  0xf7   :  { %986 = vtanh.f32 %v192_v42  ;;  %844 = vmatmul.mubr.msk.f32.vlgmr.msra.gmra.mrb[0].mxu1 %vm224_vm2, %v977_v43 }
  0xf8   :  { %988 = vtanh.f32 %v197_v39  ;;  %968 = vmatpush3.bf16.msra.mxu1 %v947_v62 }
  0xf9   :  { %v979_v44 = vpop.eup %978  ;;  %964 = vmatprep.subr.bf16.mxu1 %v951_v26 }
  0xfa   :  { %v981_v45 = vpop.eup %980  ;;  %846 = vmatprep.mubr.msk.f32.mxu1 %vm224_vm2, %v979_v44 }
  0xfb   :  { %847 = vmatmul.mubr.msk.f32.gmra.mrb[2].mxu1 %vm224_vm2, %v981_v45 }
  0xfc   :  { %969 = vmatpush3.bf16.msra.mxu1 %v951_v26 }
  0xfd   :  { %v983_v46 = vpop.eup %982  ;;  %965 = vmatprep.subr.bf16.mxu1 %v955_v29 }
  0xfe   :  { %v985_v47 = vpop.eup %984  ;;  %849 = vmatprep.mubr.msk.f32.mxu1 %vm224_vm2, %v983_v46 }
  0xff   :  { %850 = vmatmul.mubr.msk.f32.gmra.mrb[4].mxu1 %vm224_vm2, %v985_v47 }
 0x100   :  { %970 = vmatpush3.bf16.msra.mxu1 %v955_v29 }
 0x101   :  { %v987_v48 = vpop.eup %986  ;;  %966 = vmatprep.subr.bf16.mxu1 %v959_v32 }
 0x102   :  { %v989_v49 = vpop.eup %988  ;;  %852 = vmatprep.mubr.msk.f32.mxu1 %vm224_vm2, %v987_v48 }
 0x103   :  { %853 = vmatmul.mubr.msk.f32.gmra.mrb[6].mxu1 %vm224_vm2, %v989_v49 }
 0x104   :  { %971 = vmatpush3.bf16.msra.mxu1 %v959_v32 }
 0x105   :  { %967 = vmatprep.subr.mxu1 %v523_v33 }
 0x108   :  { %972 = vmatpush3.msra.mxu1 %v523_v33 }
 0x1ca   :  { %v845_v0 = vpop.f32.mrb[0].mxu1 }
 0x1cb   :  { %v321_v1 = vadd.f32 %v845_v0, %v722_v63  ;;  %v315_v2 = vpop.f32.mrb[1].mxu1 }
 0x1cc   :  { %v316_v3 = vadd.f32 %v722_v63, %v315_v2 }
 0x1ce   :  { %990 = vtanh.f32 %v316_v3  ;;  %v848_v4 = vpop.f32.mrb[2].mxu1 }
 0x1cf   :  { %992 = vtanh.f32 %v321_v1  ;;  %v331_v5 = vadd.f32 %v848_v4, %v722_v63  ;;  %v325_v6 = vpop.f32.mrb[3].mxu1 }
 0x1d0   :  { %v326_v7 = vadd.f32 %v722_v63, %v325_v6 }
 0x1d2   :  { %994 = vtanh.f32 %v326_v7  ;;  %v851_v8 = vpop.f32.mrb[4].mxu1 }
 0x1d3   :  { %996 = vtanh.f32 %v331_v5  ;;  %v341_v9 = vadd.f32 %v851_v8, %v722_v63  ;;  %v335_v10 = vpop.f32.mrb[5].mxu1  ;;  %v749_v8 = vld [vmem:[%s1331_s9] ss:$0 sm:$0xff] }
 0x1d4   :  { %v336_v11 = vadd.f32 %v722_v63, %v335_v10 }
 0x1d6   :  { %998 = vtanh.f32 %v336_v11  ;;  %v854_v12 = vpop.f32.mrb[6].mxu1  ;;  %v750_v11 = vld [vmem:[%s1332_s10] ss:$0 sm:$0xff] }
 0x1d7   :  { %1000 = vtanh.f32 %v341_v9  ;;  %v351_v13 = vadd.f32 %v854_v12, %v722_v63  ;;  %v345_v14 = vpop.f32.mrb[7].mxu1 }
 0x1d8   :  { %v991_v15 = vpop.eup %990  ;;  %v346_v16 = vadd.f32 %v722_v63, %v345_v14 }
 0x1d9   :  { %v993_v17 = vpop.eup %992  ;;  %873 = vmatprep.mubr.msk.f32.mxu0 %vm224_vm2, %v991_v15 }
 0x1da   :  { %1002 = vtanh.f32 %v346_v16  ;;  %874 = vmatmul.mubr.msk.f32.vlgmr.msra.gmra.mrb[8].mxu0 %vm224_vm2, %v993_v17 }
 0x1db   :  { %1004 = vtanh.f32 %v351_v13  ;;  %950 = vmatpush3.bf16.msra.mxu0 %v947_v62 }
 0x1dc   :  { %v995_v18 = vpop.eup %994  ;;  %952 = vmatprep.subr.bf16.mxu0 %v951_v26 }
 0x1dd   :  { %v997_v19 = vpop.eup %996  ;;  %876 = vmatprep.mubr.msk.f32.mxu0 %vm224_vm2, %v995_v18 }
 0x1de   :  { %877 = vmatmul.mubr.msk.f32.gmra.mrb[10].mxu0 %vm224_vm2, %v997_v19 }
 0x1df   :  { %954 = vmatpush3.bf16.msra.mxu0 %v951_v26 }
 0x1e0   :  { %v999_v20 = vpop.eup %998  ;;  %956 = vmatprep.subr.bf16.mxu0 %v955_v29 }
 0x1e1   :  { %v1001_v21 = vpop.eup %1000  ;;  %879 = vmatprep.mubr.msk.f32.mxu0 %vm224_vm2, %v999_v20 }
 0x1e2   :  { %880 = vmatmul.mubr.msk.f32.gmra.mrb[12].mxu0 %vm224_vm2, %v1001_v21 }
 0x1e3   :  { %958 = vmatpush3.bf16.msra.mxu0 %v955_v29 }
 0x1e4   :  { %v1003_v22 = vpop.eup %1002  ;;  %960 = vmatprep.subr.bf16.mxu0 %v959_v32 }
 0x1e5   :  { %v1005_v23 = vpop.eup %1004  ;;  %882 = vmatprep.mubr.msk.f32.mxu0 %vm224_vm2, %v1003_v22 }
 0x1e6   :  { %883 = vmatmul.mubr.msk.f32.gmra.mrb[14].mxu0 %vm224_vm2, %v1005_v23 }
 0x1e7   :  { %962 = vmatpush3.bf16.msra.mxu0 %v959_v32 }
 0x1e8   :  { %901 = vmatprep.subr.mxu0 %v523_v33 }
 0x1eb   :  { %902 = vmatpush3.msra.mxu0 %v523_v33 }
 0x2ad   :  { %v875_v35 = vpop.f32.mrb[8].mxu0 }
 0x2ae   :  { %v474_v36 = vadd.f32 %v875_v35, %v731_v34  ;;  %v468_v37 = vpop.f32.mrb[9].mxu0 }
 0x2af   :  { %v469_v38 = vadd.f32 %v731_v34, %v468_v37 }
 0x2b1   :  { %1006 = vtanh.f32 %v469_v38  ;;  %v878_v39 = vpop.f32.mrb[10].mxu0 }
 0x2b2   :  { %1008 = vtanh.f32 %v474_v36  ;;  %v484_v40 = vadd.f32 %v878_v39, %v731_v34  ;;  %v478_v41 = vpop.f32.mrb[11].mxu0 }
 0x2b3   :  { %v479_v42 = vadd.f32 %v731_v34, %v478_v41 }
 0x2b5   :  { %1010 = vtanh.f32 %v479_v42  ;;  %v881_v43 = vpop.f32.mrb[12].mxu0 }
 0x2b6   :  { %1012 = vtanh.f32 %v484_v40  ;;  %v494_v44 = vadd.f32 %v881_v43, %v731_v34  ;;  %v488_v45 = vpop.f32.mrb[13].mxu0 }
 0x2b7   :  { %v489_v46 = vadd.f32 %v731_v34, %v488_v45 }
 0x2b9   :  { %1014 = vtanh.f32 %v489_v46  ;;  %v884_v47 = vpop.f32.mrb[14].mxu0 }
 0x2ba   :  { %1016 = vtanh.f32 %v494_v44  ;;  %v504_v48 = vadd.f32 %v884_v47, %v731_v34  ;;  %v498_v49 = vpop.f32.mrb[15].mxu0 }
 0x2bb   :  { %v1007_v50 = vpop.eup %1006  ;;  %v499_v51 = vadd.f32 %v731_v34, %v498_v49 }
 0x2bc   :  { %v1009_v52 = vpop.eup %1008  ;;  %903 = vmatprep.mubr.msk.f32.mxu0 %vm224_vm2, %v1007_v50 }
 0x2bd   :  { %1018 = vtanh.f32 %v499_v51  ;;  %904 = vmatmul.mubr.msk.f32.vlgmr.msra.gmra.mrb[16].mxu0 %vm224_vm2, %v1009_v52 }
 0x2be   :  { %1020 = vtanh.f32 %v504_v48 }
 0x2bf   :  { %v1011_v53 = vpop.eup %1010 }
 0x2c0   :  { %v1013_v54 = vpop.eup %1012  ;;  %906 = vmatprep.mubr.msk.f32.mxu1 %vm224_vm2, %v1011_v53 }
 0x2c1   :  { %907 = vmatmul.mubr.msk.f32.vlgmr.msra.gmra.mrb[8].mxu1 %vm224_vm2, %v1013_v54 }
 0x2c3   :  { %v1015_v55 = vpop.eup %1014 }
 0x2c4   :  { %v1017_v56 = vpop.eup %1016  ;;  %909 = vmatprep.mubr.msk.f32.mxu1 %vm224_vm2, %v1015_v55 }
 0x2c5   :  { %910 = vmatmul.mubr.msk.f32.gmra.mrb[10].mxu1 %vm224_vm2, %v1017_v56 }
 0x2c7   :  { %v1019_v57 = vpop.eup %1018 }
 0x2c8   :  { %v1021_v58 = vpop.eup %1020  ;;  %912 = vmatprep.mubr.msk.f32.mxu1 %vm224_vm2, %v1019_v57 }
 0x2c9   :  { %913 = vmatmul.mubr.msk.f32.gmra.mrb[12].mxu1 %vm224_vm2, %v1021_v58 }
 0x390   :  { %v905_v60 = vpop.f32.mrb[16].mxu0 }
 0x391   :  { %v627_v61 = vadd.f32 %v905_v60, %v740_v59  ;;  %v621_v62 = vpop.f32.mrb[17].mxu0 }
 0x392   :  { %v622_v63 = vadd.f32 %v740_v59, %v621_v62 }
 0x393   :  { %1022 = vtanh.f32 %v627_v61 }
 0x394   :  { %1024 = vtanh.f32 %v622_v63  ;;  %v908_v0 = vpop.f32.mrb[8].mxu1 }
 0x395   :  { %v637_v1 = vadd.f32 %v908_v0, %v740_v59  ;;  %v631_v2 = vpop.f32.mrb[9].mxu1 }
 0x396   :  { %v632_v3 = vadd.f32 %v740_v59, %v631_v2 }
 0x397   :  { %1026 = vtanh.f32 %v637_v1 }
 0x398   :  { %1028 = vtanh.f32 %v632_v3  ;;  %v911_v4 = vpop.f32.mrb[10].mxu1 }
 0x399   :  { %v647_v5 = vadd.f32 %v911_v4, %v740_v59  ;;  %v641_v6 = vpop.f32.mrb[11].mxu1 }
 0x39a   :  { %v642_v7 = vadd.f32 %v740_v59, %v641_v6 }
 0x39b   :  { %1030 = vtanh.f32 %v647_v5 }
 0x39c   :  { %1032 = vtanh.f32 %v642_v7  ;;  %v914_v9 = vpop.f32.mrb[12].mxu1 }
 0x39d   :  { %v1023_v10 = vpop.eup %1022  ;;  %v657_v12 = vadd.f32 %v914_v9, %v740_v59  ;;  %v651_v13 = vpop.f32.mrb[13].mxu1 }
 0x39e   :  { %v1025_v14 = vpop.eup %1024  ;;  %v676_v15 = vmul.f32 %v1023_v10, %v749_v8  ;;  %v652_v16 = vadd.f32 %v740_v59, %v651_v13 }
 0x39f   :  { %v675_v17 = vmul.f32 %v1025_v14, %v749_v8  ;;  %1034 = vtanh.f32 %v657_v12 }
 0x3a0   :  { %v691_v18 = vadd.f32 %v750_v11, %v676_v15  ;;  %1036 = vtanh.f32 %v652_v16 }
 0x3a1   :  { %v1027_v19 = vpop.eup %1026  ;;  %v690_v20 = vadd.f32 %v750_v11, %v675_v17 }
 0x3a2   :  { %v1029_v21 = vpop.eup %1028  ;;  %700 = vst.msk [vmem:[%s1333_s11 + $0x8] sm:$0xff] %vm698_vm3, %v691_v18  ;;  %v678_v22 = vmul.f32 %v1027_v19, %v749_v8 }
 0x3a3   :  { %699 = vst.msk [vmem:[%s1333_s11] sm:$0xff] %vm698_vm3, %v690_v20  ;;  %v677_v23 = vmul.f32 %v1029_v21, %v749_v8 }
 0x3a4   :  { %v693_v24 = vadd.f32 %v750_v11, %v678_v22 }
 0x3a5   :  { %v1031_v25 = vpop.eup %1030  ;;  %v692_v26 = vadd.f32 %v750_v11, %v677_v23 }
 0x3a6   :  { %v1033_v27 = vpop.eup %1032  ;;  %702 = vst.msk [vmem:[%s1333_s11 + $0x18] sm:$0xff] %vm698_vm3, %v693_v24  ;;  %v680_v28 = vmul.f32 %v1031_v25, %v749_v8 }
 0x3a7   :  { %701 = vst.msk [vmem:[%s1333_s11 + $0x10] sm:$0xff] %vm698_vm3, %v692_v26  ;;  %v679_v29 = vmul.f32 %v1033_v27, %v749_v8 }
 0x3a8   :  { %v695_v30 = vadd.f32 %v750_v11, %v680_v28 }
 0x3a9   :  { %v1035_v31 = vpop.eup %1034  ;;  %v694_v32 = vadd.f32 %v750_v11, %v679_v29 }
 0x3aa   :  { %v1037_v33 = vpop.eup %1036  ;;  %704 = vst.msk [vmem:[%s1333_s11 + $0x28] sm:$0xff] %vm698_vm3, %v695_v30  ;;  %v682_v34 = vmul.f32 %v1035_v31, %v749_v8 }
 0x3ab   :  { %703 = vst.msk [vmem:[%s1333_s11 + $0x20] sm:$0xff] %vm698_vm3, %v694_v32  ;;  %v681_v35 = vmul.f32 %v1037_v33, %v749_v8 }
 0x3ac   :  { %v697_v36 = vadd.f32 %v750_v11, %v682_v34 }
 0x3ad   :  { %v696_v37 = vadd.f32 %v750_v11, %v681_v35 }
 0x3ae   :  { %706 = vst.msk [vmem:[%s1333_s11 + $0x38] sm:$0xff] %vm698_vm3, %v697_v36 }
 0x3af   :  { %705 = vst.msk [vmem:[%s1333_s11 + $0x30] sm:$0xff] %vm698_vm3, %v696_v37 }
 0x3b0   :  { %711 = vsyncpa [#allocation3], 1 }

</bundles_post_ra>
